<compile_context>
chip_gen: v6e
topology: v6e:2x2x1
jax: 0.10.0
libtpu: 0.0.40
codegen_flags: <defaults>
</compile_context>

<pallas_src>
import functools

import jax
import jax.numpy as jnp
from jax.experimental import pallas as pl
from jax.experimental.pallas import tpu as pltpu


def _gated_mlp_kernel(x_ref, w1_ref, b1_ref, w2_ref, b2_ref, o_ref, acc_ref,
                      *, th, nj):
    # x_ref:  (tm, D_in)
    # w1_ref: (D_in, 2*th) packed [y_j | g_j];  b1_ref: (1, 2*th)
    # w2_ref: (th, D_out);                      b2_ref: (1, D_out)
    # o_ref:  (tm, D_out);  acc_ref: (tm, D_out) f32 scratch
    j = pl.program_id(1)

    x = x_ref[...]
    if x.dtype != w1_ref.dtype:
        x = x.astype(w1_ref.dtype)  # bf16 MXU fast path when weights are bf16

    # Fused fc1: one MXU call yields both halves; f32 accumulation.
    yg = jnp.dot(x, w1_ref[...], preferred_element_type=jnp.float32)
    yg = yg + b1_ref[...].astype(jnp.float32)
    y = yg[:, :th]          # static lane slice at a 128-multiple (free)
    g = yg[:, th:]

    # y * SiLU(gate) in f32 (EUP sigmoid + VPU muls).
    act = y * (g * jax.nn.sigmoid(g))

    partial = jnp.dot(act.astype(w2_ref.dtype), w2_ref[...],
                      preferred_element_type=jnp.float32)
    b2f = b2_ref[...].astype(jnp.float32)

    if nj == 1:
        # Single hidden tile: skip the accumulator entirely.
        o_ref[...] = (partial + b2f).astype(o_ref.dtype)
    else:
        @pl.when(j == 0)
        def _():
            acc_ref[...] = partial + b2f     # no separate zero-init pass

        @pl.when(jnp.logical_and(j > 0, j < nj - 1))
        def _():
            acc_ref[...] += partial

        @pl.when(j == nj - 1)
        def _():
            # Fold the last partial straight into the output store: saves one
            # (tm, D_out) f32 accumulator write + read per row tile.
            o_ref[...] = (acc_ref[...] + partial).astype(o_ref.dtype)


def _round_up(n, m):
    return (n + m - 1) // m * m


def _pick_hidden_tile(hidden, target, granule):
    """Largest multiple of `granule` that divides `hidden` and is <= target."""
    if hidden <= target:
        return hidden
    best = granule
    for t in range(granule, target + 1, granule):
        if hidden % t == 0:
            best = t
    return best


def _chip_policy():
    """Return (vmem_budget, tm_target, th_target, vmem_capacity) per TPU gen."""
    try:
        vmem_cap = int(pltpu.get_tpu_info().vmem_capacity_bytes)
    except Exception:
        vmem_cap = 128 << 20
    try:
        kind = jax.devices()[0].device_kind.lower()
    except Exception:
        kind = ""
    is_v5e = ("v5 lite" in kind) or ("v5e" in kind) or ("v5litepod" in kind)
    if vmem_cap <= (64 << 20):
        # v7x-class: 64 MiB physical VMEM; leave headroom for Mosaic scratch.
        return 52 << 20, 640, 512, vmem_cap
    if is_v5e:
        # Past the compute/HBM crossover already at ~240 rows; prefer big th.
        return 100 << 20, 384, 512, vmem_cap
    # v6e-class (128 MiB VMEM): crossover ~670 rows -> large row tile.
    return 100 << 20, 1024, 512, vmem_cap


def _vmem_estimate(tm, th, d_in, d_out, x_bytes, w_bytes, out_bytes):
    """Double-buffered pipeline tiles + f32 accumulator + in-kernel f32 temps."""
    return (2 * tm * d_in * x_bytes                 # x tile
            + 2 * d_in * 2 * th * w_bytes           # packed W1 tile
            + 2 * 8 * 2 * th * w_bytes              # b1 tile (sublane-padded)
            + 2 * th * d_out * w_bytes              # W2 tile
            + 2 * 8 * max(d_out, 128) * w_bytes     # b2 tile
            + 2 * tm * d_out * out_bytes            # output tile
            + tm * d_out * 4                        # f32 accumulator scratch
            + tm * d_out * 4                        # f32 partial
            + 7 * tm * th * 4)                      # f32 yg / y / g / act temps


@functools.partial(jax.jit,
                   static_argnames=("tm_target", "th_target", "allow_bf16"))
def gated_mlp_pallas(x, w1y, w1g, b1y, b1g, w2, b2, *,
                     tm_target=None, th_target=None, allow_bf16=True):
    """x: (M, D_in); w1y/w1g: (D_in, H); b1y/b1g: (1, H);
    w2: (H, D_out); b2: (1, D_out).  Returns (M, D_out) in x.dtype."""
    M, D_in = x.shape
    H, D_out = w2.shape
    out_dtype = x.dtype

    budget, tm_t, th_t, vmem_cap = _chip_policy()
    if tm_target is not None:
        tm_t = tm_target
    if th_target is not None:
        th_t = th_target

    # Optional bf16 MXU fast path: cast weights once here (also halves the
    # weight-streaming HBM traffic); x / act are cast per tile in the kernel.
    if allow_bf16 and w2.dtype == jnp.float32:
        w1y = w1y.astype(jnp.bfloat16)
        w1g = w1g.astype(jnp.bfloat16)
        w2 = w2.astype(jnp.bfloat16)

    x_bytes = jnp.dtype(x.dtype).itemsize
    w_bytes = jnp.dtype(w2.dtype).itemsize
    out_bytes = jnp.dtype(out_dtype).itemsize

    # Row tile: 8-granular, capped by padded M.
    tm = min(tm_t, _round_up(M, 8))
    # Hidden tile: 256-granular where H allows (v6e/v7x MXU), else 128.
    granule = 256 if H % 256 == 0 else 128
    th = _pick_hidden_tile(H, th_t, granule)
    if H % th != 0:      # safety for H not a multiple of the granule
        th = H

    def est(a, b):
        return _vmem_estimate(a, b, D_in, D_out, x_bytes, w_bytes, out_bytes)

    # Shrink to the per-chip VMEM budget: th first (keeps arithmetic
    # intensity per streamed weight byte high), then tm.
    while est(tm, th) > budget and th > granule and H % granule == 0:
        th = _pick_hidden_tile(H, max(granule, th - granule), granule)
    while est(tm, th) > budget and tm > 64:
        tm = max(64, _round_up(tm // 2, 8))

    M_pad = _round_up(M, tm)
    if M_pad != M:
        x = jnp.pad(x, ((0, M_pad - M), (0, 0)))

    nj = H // th
    grid = (M_pad // tm, nj)

    # Pack W1 / b1 per hidden tile as [y_j | g_j] so the kernel does a single
    # fused fc1 matmul per step and splits with a free static lane slice.
    w1p = jnp.concatenate(
        [w1y.reshape(D_in, nj, th), w1g.reshape(D_in, nj, th)],
        axis=2).reshape(D_in, 2 * H)
    b1p = jnp.concatenate(
        [b1y.reshape(1, nj, th), b1g.reshape(1, nj, th)],
        axis=2).reshape(1, 2 * H)

    # VMEM limit: at least the budget, never the full physical capacity.
    vmem_limit = int(min(max(budget, est(tm, th) + (8 << 20)),
                         vmem_cap - (8 << 20)))

    n_row_tiles = M_pad // tm
    weight_bytes = (D_in * 2 * H * w_bytes + H * D_out * w_bytes
                    + 2 * H * jnp.dtype(b1p.dtype).itemsize
                    + D_out * jnp.dtype(b2.dtype).itemsize)
    cost = pl.CostEstimate(
        flops=2 * M_pad * (2 * D_in * H + H * D_out),
        transcendentals=2 * M_pad * H,                 # sigmoid ~ exp + recip
        bytes_accessed=(M_pad * D_in * x_bytes
                        + n_row_tiles * weight_bytes   # weights re-streamed per row tile
                        + M_pad * D_out * out_bytes),
    )

    kernel = functools.partial(_gated_mlp_kernel, th=th, nj=nj)

    # NOTE: for real models D_out is a multiple of 128, so the output slab is
    # lane-dense; the tiny D_out in the demo only incurs masked stores there.
    out = pl.pallas_call(
        kernel,
        out_shape=jax.ShapeDtypeStruct((M_pad, D_out), out_dtype),
        grid_spec=pltpu.PrefetchScalarGridSpec(
            num_scalar_prefetch=0,
            grid=grid,
            in_specs=[
                pl.BlockSpec((tm, D_in), lambda i, j: (i, 0)),
                pl.BlockSpec((D_in, 2 * th), lambda i, j: (0, j)),
                pl.BlockSpec((1, 2 * th), lambda i, j: (0, j)),
                pl.BlockSpec((th, D_out), lambda i, j: (j, 0)),
                pl.BlockSpec((1, D_out), lambda i, j: (0, 0)),
            ],
            out_specs=pl.BlockSpec((tm, D_out), lambda i, j: (i, 0)),
            scratch_shapes=[pltpu.VMEM((tm, D_out), jnp.float32)],
        ),
        compiler_params=pltpu.CompilerParams(
            dimension_semantics=("parallel", "arbitrary"),
            vmem_limit_bytes=vmem_limit),
        cost_estimate=cost,
    )(x, w1p, b1p, w2, b2)

    return out[:M] if M_pad != M else out


class GatedMlpPallas:
    """Mirror of relseg GatedMlp sizing logic; forward via Pallas."""

    def __init__(self, in_features, hidden_features=None, out_features=None,
                 multiple_of=128, return_residual=False, key=None,
                 dtype=jnp.float32, allow_bf16=True):
        out_features = out_features if out_features is not None else in_features
        hidden_features = (hidden_features if hidden_features is not None
                           else int(8 * in_features / 3))
        hidden_features = ((hidden_features + multiple_of - 1)
                           // multiple_of * multiple_of)
        self.in_features = in_features
        self.hidden_features = hidden_features
        self.out_features = out_features
        self.return_residual = return_residual
        self.allow_bf16 = allow_bf16

        key = jax.random.PRNGKey(0) if key is None else key
        k1, k2, k3, k4 = jax.random.split(key, 4)
        bound1 = 1.0 / (in_features ** 0.5)
        bound2 = 1.0 / (hidden_features ** 0.5)
        # fc1 stored pre-transposed (in, 2H), split into y / gate halves.
        w1 = jax.random.uniform(k1, (in_features, 2 * hidden_features),
                                dtype, -bound1, bound1)
        b1 = jax.random.uniform(k2, (1, 2 * hidden_features),
                                dtype, -bound1, bound1)
        self.w1y = w1[:, :hidden_features]
        self.w1g = w1[:, hidden_features:]
        self.b1y = b1[:, :hidden_features]
        self.b1g = b1[:, hidden_features:]
        self.w2 = jax.random.uniform(k3, (hidden_features, out_features),
                                     dtype, -bound2, bound2)
        self.b2 = jax.random.uniform(k4, (1, out_features),
                                     dtype, -bound2, bound2)

    def __call__(self, x):
        # x: (..., in_features) -> (..., out_features)
        lead = x.shape[:-1]
        x2d = x.reshape(-1, self.in_features)
        y2d = gated_mlp_pallas(x2d, self.w1y, self.w1g, self.b1y, self.b1g,
                               self.w2, self.b2, allow_bf16=self.allow_bf16)
        y = y2d.reshape(*lead, self.out_features)
        return (y, x) if self.return_residual else y


def _reference(x, w1y, w1g, b1y, b1g, w2, b2):
    y = x @ w1y + b1y
    g = x @ w1g + b1g
    act = y * (g * jax.nn.sigmoid(g))
    return act @ w2 + b2


if __name__ == "__main__":
    batch, seq, in_features = 2, 8, 32
    # Exact f32 path for the tight correctness check.
    mlp = GatedMlpPallas(in_features, key=jax.random.PRNGKey(0),
                         allow_bf16=False)

    kx = jax.random.PRNGKey(42)
    x = jax.random.normal(kx, (batch, seq, in_features), jnp.float32)

    out = jax.block_until_ready(mlp(x))
    assert out.shape == (batch, seq, in_features), out.shape

    x2d = x.reshape(-1, in_features)
    ref = _reference(x2d, mlp.w1y, mlp.w1g, mlp.b1y, mlp.b1g, mlp.w2, mlp.b2)
    ref = ref.reshape(batch, seq, in_features)
    assert jnp.allclose(out, ref, atol=3e-5, rtol=3e-5), \
        float(jnp.max(jnp.abs(out - ref)))

    # bf16 MXU fast path: same weights, loose tolerance.
    out_bf16 = gated_mlp_pallas(x2d, mlp.w1y, mlp.w1g, mlp.b1y, mlp.b1g,
                                mlp.w2, mlp.b2, allow_bf16=True)
    out_bf16 = jax.block_until_ready(out_bf16).reshape(batch, seq, in_features)
    assert jnp.allclose(out_bf16, ref, atol=6e-2, rtol=6e-2), \
        float(jnp.max(jnp.abs(out_bf16 - ref)))

    print("KERNEL_OK")
</pallas_src>

<mosaic_0001>
module attributes {stable_mosaic.version = 11 : i64} {
  func.func @_gated_mlp_kernel(%arg0: i32, %arg1: i32, %arg2: memref<16x32xf32, #tpu.memory_space<vmem>>, %arg3: memref<32x256xf32, #tpu.memory_space<vmem>>, %arg4: memref<1x256xf32, #tpu.memory_space<vmem>>, %arg5: memref<128x32xf32, #tpu.memory_space<vmem>>, %arg6: memref<1x32xf32, #tpu.memory_space<vmem>>, %arg7: memref<16x32xf32, #tpu.memory_space<vmem>>, %arg8: memref<16x32xf32, #tpu.memory_space<vmem>>) attributes {dimension_semantics = [#tpu.dimension_semantics<parallel>, #tpu.dimension_semantics<arbitrary>], iteration_bounds = array<i64: 1, 1>, scalar_prefetch = 0 : i64, scratch_operands = 1 : i64, tpu.core_type = #tpu.core_type<tc>, window_params = [{transform_indices = @transform_0, window_bounds = array<i64: 16, 32>}, {transform_indices = @transform_1, window_bounds = array<i64: 32, 256>}, {transform_indices = @transform_2, window_bounds = array<i64: 1, 256>}, {transform_indices = @transform_3, window_bounds = array<i64: 128, 32>}, {pipeline_mode = #tpu.pipeline_mode<synchronous>, transform_indices = @transform_4, window_bounds = array<i64: 1, 32>}, {transform_indices = @transform_5, window_bounds = array<i64: 16, 32>}]} {
    %c0 = arith.constant 0 : index
    %c0_0 = arith.constant 0 : index
    %0 = vector.load %arg2[%c0, %c0_0] : memref<16x32xf32, #tpu.memory_space<vmem>>, vector<16x32xf32>
    %c0_1 = arith.constant 0 : index
    %c0_2 = arith.constant 0 : index
    %1 = vector.load %arg3[%c0_1, %c0_2] : memref<32x256xf32, #tpu.memory_space<vmem>>, vector<32x256xf32>
    %cst = arith.constant dense<0.000000e+00> : vector<16x256xf32>
    %2 = tpu.matmul %0, %1, %cst {dimension_numbers = #tpu.dot_dimension_numbers<[1], [0], [0], [1], [0, 0, 1, 1], [], []>} : vector<16x32xf32>, vector<32x256xf32>, vector<16x256xf32> -> vector<16x256xf32>
    %c0_3 = arith.constant 0 : index
    %c0_4 = arith.constant 0 : index
    %3 = vector.load %arg4[%c0_3, %c0_4] : memref<1x256xf32, #tpu.memory_space<vmem>>, vector<1x256xf32>
    %4 = vector.broadcast %3 : vector<1x256xf32> to vector<16x256xf32>
    %5 = arith.addf %2, %4 : vector<16x256xf32>
    %6 = vector.extract_strided_slice %5 {offsets = [0, 0], sizes = [16, 128], strides = [1, 1]} : vector<16x256xf32> to vector<16x128xf32>
    %7 = vector.extract_strided_slice %5 {offsets = [0, 128], sizes = [16, 128], strides = [1, 1]} : vector<16x256xf32> to vector<16x128xf32>
    %8 = arith.negf %7 : vector<16x128xf32>
    %9 = math.exp %8 : vector<16x128xf32>
    %cst_5 = arith.constant 1.000000e+00 : f32
    %10 = vector.broadcast %cst_5 : f32 to vector<16x128xf32>
    %11 = arith.addf %10, %9 : vector<16x128xf32>
    %12 = arith.divf %10, %11 : vector<16x128xf32>
    %13 = arith.mulf %7, %12 : vector<16x128xf32>
    %14 = arith.mulf %6, %13 : vector<16x128xf32>
    %c0_6 = arith.constant 0 : index
    %c0_7 = arith.constant 0 : index
    %15 = vector.load %arg5[%c0_6, %c0_7] : memref<128x32xf32, #tpu.memory_space<vmem>>, vector<128x32xf32>
    %cst_8 = arith.constant dense<0.000000e+00> : vector<16x32xf32>
    %16 = tpu.matmul %14, %15, %cst_8 {dimension_numbers = #tpu.dot_dimension_numbers<[1], [0], [0], [1], [0, 0, 1, 1], [], []>} : vector<16x128xf32>, vector<128x32xf32>, vector<16x32xf32> -> vector<16x32xf32>
    %c0_9 = arith.constant 0 : index
    %c0_10 = arith.constant 0 : index
    %17 = vector.load %arg6[%c0_9, %c0_10] : memref<1x32xf32, #tpu.memory_space<vmem>>, vector<1x32xf32>
    %18 = vector.broadcast %17 : vector<1x32xf32> to vector<16x32xf32>
    %19 = arith.addf %16, %18 : vector<16x32xf32>
    %c0_11 = arith.constant 0 : index
    %c0_12 = arith.constant 0 : index
    %20 = vector.load %arg7[%c0_11, %c0_12] : memref<16x32xf32, #tpu.memory_space<vmem>>, vector<16x32xf32>
    tpu.vector_store %arg7[%c0_11, %c0_12], %19 {strides = array<i32>} : memref<16x32xf32, #tpu.memory_space<vmem>>, vector<16x32xf32>,
    return
  }
  func.func @transform_0(%arg0: i32, %arg1: i32) -> (i32, i32) {
    %c0_i32 = arith.constant 0 : i32
    %c0_i32_0 = arith.constant 0 : i32
    return %arg0, %c0_i32 : i32, i32
  }
  func.func @transform_1(%arg0: i32, %arg1: i32) -> (i32, i32) {
    %c0_i32 = arith.constant 0 : i32
    %c0_i32_0 = arith.constant 0 : i32
    return %c0_i32, %arg1 : i32, i32
  }
  func.func @transform_2(%arg0: i32, %arg1: i32) -> (i32, i32) {
    %c0_i32 = arith.constant 0 : i32
    %c0_i32_0 = arith.constant 0 : i32
    return %c0_i32, %arg1 : i32, i32
  }
  func.func @transform_3(%arg0: i32, %arg1: i32) -> (i32, i32) {
    %c0_i32 = arith.constant 0 : i32
    %c0_i32_0 = arith.constant 0 : i32
    return %arg1, %c0_i32 : i32, i32
  }
  func.func @transform_4(%arg0: i32, %arg1: i32) -> (i32, i32) {
    %c0_i32 = arith.constant 0 : i32
    %c0_i32_0 = arith.constant 0 : i32
    %c0_i32_1 = arith.constant 0 : i32
    return %c0_i32, %c0_i32_0 : i32, i32
  }
  func.func @transform_5(%arg0: i32, %arg1: i32) -> (i32, i32) {
    %c0_i32 = arith.constant 0 : i32
    %c0_i32_0 = arith.constant 0 : i32
    return %arg0, %c0_i32 : i32, i32
  }
}

</mosaic_0001>

<bundles_post_ra>
// kernel: gated_mlp_pallas.1
= control target key start
LH: loop header
LB: loop body
LE: loop exit
PB: predicated region body
PF: predicated region fallthrough
CT: control target
= control target key end

     0   :  { %v351_v4 = vmov 0.0   ;;  %s476_s0 = inlined_call_operand.vmem [shape: f32[16,32], index: 0, kind: input, shape index: {}]   ;;  %s477_s1 = inlined_call_operand.vmem [shape: f32[32,256], index: 1, kind: input, shape index: {}]   ;;  %s478_s2 = inlined_call_operand.vmem [shape: f32[1,256], index: 2, kind: input, shape index: {}]   ;;  %s479_s3 = inlined_call_operand.vmem [shape: f32[128,32], index: 3, kind: input, shape index: {}]   ;;  %s480_s4 = inlined_call_operand.vmem [shape: f32[1,32], index: 4, kind: input, shape index: {}]   ;;  %s481_s5 = inlined_call_operand.hbm [shape: f32[16,32], index: 5, kind: output, shape index: {}]  }
   0x1   :  { %v30_v0 = vld [vmem:[%s477_s1 + $0x38] sm:$0xff]  ;;  %v29_v1 = vld [vmem:[%s477_s1 + $0x30] sm:$0xff]  ;;  %v28_v2 = vld [vmem:[%s477_s1 + $0x28] sm:$0xff]  ;;  %114 = vmatprep.mubr.f32.mxu0 %v351_v4 }
   0x2   :  { %74 = vmatprep.subr.mxu0 %v30_v0  ;;  %v27_v3 = vld [vmem:[%s477_s1 + $0x20] sm:$0xff]  ;;  %v26_v5 = vld [vmem:[%s477_s1 + $0x18] sm:$0xff]  ;;  %v25_v6 = vld [vmem:[%s477_s1 + $0x10] sm:$0xff] }
   0x3   :  { %75 = vmatpush1.msra.mxu0 %v29_v1 }
   0x4   :  { %76 = vmatprep.subr.mxu0 %v28_v2 }
   0x5   :  { %10 = vsyncpa [#allocation4], 0  ;;  %77 = vmatpush1.msra.mxu0 %v27_v3  ;;  %v24_v7 = vld [vmem:[%s477_s1 + $0x8] sm:$0xff]  ;;  %v23_v8 = vld [vmem:[%s477_s1] sm:$0xff]  ;;  %vm43_vm0 = vcmask 261120   ;;  %v33_v27 = vlaneseq  ;;  %s352_s18 = smov [#allocation3]  }
   0x6   :  { %78 = vmatprep.subr.mxu0 %v26_v5  ;;  %v21_v9 = vld [vmem:[%s476_s0] sm:$0xff]  ;;  %v22_v10 = vld [vmem:[%s476_s0 + $0x8] sm:$0xff]  ;;  %v158_v11 = vld [vmem:[%s479_s3 + $0x78] sm:$0xff]  ;;  %s248_s19 = sshll.u32 %s352_s18, 4  ;;  %s249_s19 = int_to_ptr.vmem [resolvable:$true] %s248_s19 }
   0x7   :  { %79 = vmatpush1.msra.mxu0 %v25_v6  ;;  %282 = vmatprep.subr.mxu1 %v158_v11  ;;  %v157_v12 = vld [vmem:[%s479_s3 + $0x70] sm:$0xff]  ;;  %v156_v13 = vld [vmem:[%s479_s3 + $0x68] sm:$0xff]  ;;  %v155_v14 = vld [vmem:[%s479_s3 + $0x60] sm:$0xff]  ;;  %v34_v28 = vshrl.u32 %v33_v27, 7  ;;  %s329_s20 = scalar_lea.vmem %s249_s19, 256  ;;  %p334_p1 = scmp.lt.s32.totalorder %s249_s19, %s249_s19 }
   0x8   :  { %80 = vmatprep.subr.mxu0 %v24_v7  ;;  %283 = vmatpush3.msra.mxu1 %v158_v11  ;;  %v154_v15 = vld [vmem:[%s479_s3 + $0x58] sm:$0xff]  ;;  %v153_v16 = vld [vmem:[%s479_s3 + $0x50] sm:$0xff]  ;;  %v152_v17 = vld [vmem:[%s479_s3 + $0x48] sm:$0xff]  ;;  %p330_p0 = scmp.ne.s32.totalorder %s249_s19, %s329_s20  ;;  %p335_p2 = scmp.lt.s32.totalorder %s329_s20, %s329_s20 }
   0x9   :  { %81 = vmatpush1.msra.mxu0 %v23_v8  ;;  %284 = vmatprep.subr.mxu1 %v157_v12  ;;  %v151_v18 = vld [vmem:[%s479_s3 + $0x40] sm:$0xff]  ;;  %v150_v19 = vld [vmem:[%s479_s3 + $0x38] sm:$0xff]  ;;  %v149_v20 = vld [vmem:[%s479_s3 + $0x30] sm:$0xff]  ;;  %v39_v29 = vsub.s32 1, %v34_v28  ;;  %v35_v44 = vsub.s32 0, %v34_v28 }
   0xa   :  { %259 = vmatmul.mubr.msk.f32.vlgmr.msra.gmra.mxu0 %vm43_vm0, %v21_v9  ;;  %285 = vmatpush3.msra.mxu1 %v157_v12  ;;  %v148_v21 = vld [vmem:[%s479_s3 + $0x28] sm:$0xff]  ;;  %v147_v22 = vld [vmem:[%s479_s3 + $0x20] sm:$0xff]  ;;  %v146_v23 = vld [vmem:[%s479_s3 + $0x18] sm:$0xff]  ;;  %p336_p3 = por %p335_p2, %p334_p1 }
   0xb   :  { %120 = vmatprep.mubr.f32.mxu0 %v351_v4  ;;  %286 = vmatprep.subr.mxu1 %v156_v13  ;;  %v145_v24 = vld [vmem:[%s479_s3 + $0x10] sm:$0xff]  ;;  %v144_v25 = vld [vmem:[%s479_s3 + $0x8] sm:$0xff]  ;;  %v143_v26 = vld [vmem:[%s479_s3] sm:$0xff] }
   0xc   :  { %287 = vmatpush3.msra.mxu1 %v156_v13  ;;  %v31_v30 = vld [vmem:[%s478_s2] sm:$0x3]  ;;  %p337_p4 = pnand %p336_p3, %p330_p0 }
   0xd   :  { %288 = vmatprep.subr.mxu1 %v155_v14  ;;  %v40_v31 = vrot.slane %v31_v30, %v39_v29  ;;  %v36_v45 = vrot.slane %v31_v30, %v35_v44  ;;  %v263_v54 = vld [vmem:[%s480_s4] ss:$0 sm:$0xff] }
   0xe   :  { %260 = vmatmul.mubr.msk.f32.gmra.mxu0 %vm43_vm0, %v22_v10  ;;  %289 = vmatpush3.msra.mxu1 %v155_v14 }
   0xf   :  { %290 = vmatprep.subr.mxu1 %v154_v15 }
  0x10   :  { %291 = vmatpush3.msra.mxu1 %v154_v15 }
  0x11   :  { %292 = vmatprep.subr.mxu1 %v153_v16 }
  0x12   :  { %293 = vmatpush3.msra.mxu1 %v153_v16 }
  0x13   :  { %294 = vmatprep.subr.mxu1 %v152_v17 }
  0x14   :  { %295 = vmatpush3.msra.mxu1 %v152_v17 }
  0x15   :  { %296 = vmatprep.subr.mxu1 %v151_v18 }
  0x16   :  { %297 = vmatpush3.msra.mxu1 %v151_v18 }
  0x17   :  { %298 = vmatprep.subr.mxu1 %v150_v19 }
  0x18   :  { %299 = vmatpush3.msra.mxu1 %v150_v19 }
  0x19   :  { %300 = vmatprep.subr.mxu1 %v149_v20 }
  0x1a   :  { %301 = vmatpush3.msra.mxu1 %v149_v20 }
  0x1b   :  { %302 = vmatprep.subr.mxu1 %v148_v21 }
  0x1c   :  { %303 = vmatpush3.msra.mxu1 %v148_v21 }
  0x1d   :  { %304 = vmatprep.subr.mxu1 %v147_v22 }
  0x1e   :  { %305 = vmatpush3.msra.mxu1 %v147_v22 }
  0x1f   :  { %306 = vmatprep.subr.mxu1 %v146_v23 }
  0x20   :  { %307 = vmatpush3.msra.mxu1 %v146_v23 }
  0x21   :  { %308 = vmatprep.subr.mxu1 %v145_v24 }
  0x22   :  { %309 = vmatpush3.msra.mxu1 %v145_v24 }
  0x23   :  { %310 = vmatprep.subr.mxu1 %v144_v25 }
  0x24   :  { %311 = vmatpush3.msra.mxu1 %v144_v25 }
  0x25   :  { %312 = vmatprep.subr.mxu1 %v143_v26 }
  0x26   :  { %313 = vmatpush3.msra.mxu1 %v143_v26 }
  0xca   :  { %v116_v32 = vpop.f32.mrf.mxu0 }
  0xcb   :  { %v117_v47 = vadd.f32 %v116_v32, %v36_v45 }
  0xcc   :  { %v118_v33 = vpop.f32.mrf.mxu0 }
  0xcd   :  { %v119_v34 = vadd.f32 %v118_v33, %v40_v31 }
  0xce   :  { %v122_v35 = vpop.f32.mrf.mxu0 }
  0xcf   :  { %v261_v36 = vmul.f32 -1.442695, %v119_v34  ;;  %v123_v51 = vadd.f32 %v122_v35, %v36_v45 }
  0xd0   :  { %v124_v37 = vpop.f32.mrf.mxu0 }
  0xd1   :  { %321 = vpow2.f32 %v261_v36  ;;  %v125_v38 = vadd.f32 %v124_v37, %v40_v31 }
  0xd3   :  { %v262_v39 = vmul.f32 -1.442695, %v125_v38 }
  0xd5   :  { %323 = vpow2.f32 %v262_v39 }
  0xde   :  { %v322_v40 = vpop.eup %321 }
  0xdf   :  { %v133_v41 = vadd.f32 1.0, %v322_v40 }
  0xe1   :  { %325 = vrcp.f32 %v133_v41 }
  0xe2   :  { %v324_v42 = vpop.eup %323 }
  0xe3   :  { %v134_v43 = vadd.f32 1.0, %v324_v42 }
  0xe5   :  { %327 = vrcp.f32 %v134_v43 }
  0xee   :  { %v326_v46 = vpop.eup %325 }
  0xef   :  { %v139_v48 = vmul.f32 %v326_v46, %v119_v34 }
  0xf1   :  { %v141_v49 = vmul.f32 %v139_v48, %v117_v47 }
  0xf2   :  { %v328_v50 = vpop.eup %327 }
  0xf3   :  { %v140_v52 = vmul.f32 %v328_v50, %v125_v38  ;;  %314 = vmatprep.mubr.f32.mxu1 %v141_v49 }
  0xf5   :  { %v142_v53 = vmul.f32 %v140_v52, %v123_v51 }
  0xf7   :  { %315 = vmatmul.mubr.f32.vlgmr.msra.gmra.mxu1 %v142_v53 }
 0x1b7   :  { %v316_v55 = vpop.f32.mrf.mxu1 }
 0x1b8   :  { %v238_v56 = vadd.f32 %v316_v55, %v263_v54 }
 0x1b9   :  { %v232_v57 = vpop.f32.mrf.mxu1 }
 0x1ba   :  { %242 = vst.msk [vmem:[#allocation3 + $0x8] sm:$0xff] %vm43_vm0, %v238_v56  ;;  %v233_v58 = vadd.f32 %v263_v54, %v232_v57 }
 0x1bc   :  { %241 = vst.msk [vmem:[#allocation3] sm:$0xff] %vm43_vm0, %v233_v58 }
 0x1bd   :  { %340 = shalt.err (!%p337_p4)
}
 0x1be   :  { %s353_s21 = smov 128   ;;  %s354_s4 = smov 8  }
 0x1bf   :  { %254 = dma.vmem_to_hbm [thread:$0]  %s249_s19, 256, %s481_s5, [#allocation4], %s353_s21, %s353_s21, %s354_s4  }
 0x1c0   :  { %349 = dma.done.wait [#allocation4], 256  }
 0x1c1   :  { %350 = vsyncadd [#allocation4], 4294967040 }
 0x1c2   :  { %258 = vsyncpa [#allocation4], 1 }

</bundles_post_ra>
